<compile_context>
chip_gen: v7x
topology: tpu7x:2x2x1
jax: 0.10.0
libtpu: 0.0.40
codegen_flags: <defaults>
</compile_context>

<pallas_src>
import numpy as np
import jax
import jax.numpy as jnp
from jax.experimental import pallas as pl
from jax.experimental.pallas import tpu as pltpu


_LANE = 128                              # TPU lane width; output tiles stay lane-dense.
_VMEM_STEP_BUDGET = 12 * 1024 * 1024     # per-step pipelined footprint target (all gens).
_VMEM_LIMIT = 32 * 1024 * 1024           # explicit scoped-VMEM limit (<= physical everywhere).


# ---------------------------------------------------------------------------
# Kernel: one (2N, 2N) @ (2N, ts) MXU dot per (batch, spatial-tile) grid step.
# Weight is f32 and fully VMEM-resident; activations may be bf16 (promoted on
# the VPU); accumulation is f32 on the MXU.
# ---------------------------------------------------------------------------
def _fft_linear_kernel(w_ref, x_ref, y_ref):
    y_ref[...] = jnp.dot(
        w_ref[...], x_ref[...].astype(jnp.float32),
        preferred_element_type=jnp.float32,
    ).astype(y_ref.dtype)


def _pick_spatial_tile(s_pad: int, two_n: int, x_bytes: int, y_bytes: int,
                       batch: int) -> int:
    """Largest 128-multiple divisor of s_pad whose double-buffered footprint
    fits the per-step VMEM budget; then shrunk (if needed) so the grid has at
    least 2 steps (v7x megacore has 2 TensorCores)."""
    w_bytes = two_n * two_n * 4
    per_lane = 2 * two_n * (x_bytes + y_bytes)            # x + y blocks, double-buffered
    ts_budget = max(_LANE, (_VMEM_STEP_BUDGET - 2 * w_bytes) // per_lane)
    ts = _LANE                                            # always divides s_pad
    for cand in range(min(s_pad, 4096), _LANE - 1, -_LANE):
        if s_pad % cand == 0 and cand <= ts_budget:
            ts = cand
            break
    while batch * (s_pad // ts) < 2 and ts % (2 * _LANE) == 0:
        ts //= 2
    return ts


# ---------------------------------------------------------------------------
# Pass-free entry point: y = W @ x along the channel axis.
#   x_stacked : (B, 2N, S) with [real ; imag] stacked on the channel axis.
#   weight    : (2N, 2N)   the nn.Linear weight (applied as W @ x == x @ W.T).
#   returns   : (B, 2N, S) stacked [real ; imag] output in `out_dtype`.
# ---------------------------------------------------------------------------
def fft_linear_stacked(x_stacked, weight, *, out_dtype=jnp.float32):
    B, two_n, S = x_stacked.shape
    assert weight.shape == (two_n, two_n)

    # Lane-dense stores: pad the spatial axis to a multiple of 128.
    s_pad = -(-S // _LANE) * _LANE
    if s_pad != S:
        x_stacked = jnp.pad(x_stacked, ((0, 0), (0, 0), (0, s_pad - S)))

    ts = _pick_spatial_tile(s_pad, two_n, x_stacked.dtype.itemsize,
                            jnp.dtype(out_dtype).itemsize, B)
    grid = (B, s_pad // ts)

    x_spec = pl.BlockSpec((None, two_n, ts), lambda b, s: (b, 0, s))
    y_spec = pl.BlockSpec((None, two_n, ts), lambda b, s: (b, 0, s))
    # Full weight resident in VMEM (constant index_map -> fetched once).  For
    # large N the second buffer is pure VMEM waste, so single-buffer it there.
    if two_n >= 512:
        w_spec = pl.BlockSpec((two_n, two_n), lambda b, s: (0, 0),
                              pipeline_mode=pl.Buffered(1))
    else:
        w_spec = pl.BlockSpec((two_n, two_n), lambda b, s: (0, 0))

    y = pl.pallas_call(
        _fft_linear_kernel,
        out_shape=jax.ShapeDtypeStruct((B, two_n, s_pad), out_dtype),
        grid_spec=pltpu.PrefetchScalarGridSpec(
            num_scalar_prefetch=0,
            grid=grid,
            in_specs=[w_spec, x_spec],
            out_specs=y_spec,
        ),
        compiler_params=pltpu.CompilerParams(
            dimension_semantics=("parallel", "parallel"),
            vmem_limit_bytes=_VMEM_LIMIT),
    )(weight.astype(jnp.float32), x_stacked)

    if s_pad != S:
        y = y[:, :, :S]
    return y


# ---------------------------------------------------------------------------
# Parameter construction (use_fft_weights=True path, deterministic):
#   W = [[Re(D), -Im(D)], [Im(D), Re(D)]],  D[j,k] = exp(-2*pi*i*j*k/N)
# ---------------------------------------------------------------------------
def make_fft_linear_weight(input_size: int) -> jnp.ndarray:
    N = input_size
    j, k = np.meshgrid(np.arange(N), np.arange(N), indexing="ij")
    dft = np.exp(-2j * np.pi * j * k / N).astype(np.complex64)
    top = np.concatenate((dft.real, -dft.imag), axis=1)
    bot = np.concatenate((dft.imag, dft.real), axis=1)
    return jnp.asarray(np.concatenate((top, bot), axis=0).astype(np.float32))


# ---------------------------------------------------------------------------
# Faithful FirstFFTLinearLayer.forward: complex64 NCHW in -> complex64 NCHW out.
# Works for an arbitrary (trained) (2N, 2N) weight, not just the DFT init.
# ---------------------------------------------------------------------------
def first_fft_linear_forward(complex_adc: jnp.ndarray,
                             weight: jnp.ndarray) -> jnp.ndarray:
    B, C, H, W = complex_adc.shape
    N = weight.shape[0] // 2
    assert C == N and weight.shape == (2 * N, 2 * N)
    S = H * W

    # Channel-major stacked layout (no NCHW<->NHWC transposes).  One fused XLA
    # pass builds the bf16 (B, 2N, S) input: real on channels [0, N), imag on
    # [N, 2N).  Weight stays f32 for accuracy (it lives in VMEM; its cost is nil).
    xr = jnp.real(complex_adc).reshape(B, N, S)
    xi = jnp.imag(complex_adc).reshape(B, N, S)
    x_stacked = jnp.concatenate([xr, xi], axis=1).astype(jnp.bfloat16)

    y = fft_linear_stacked(x_stacked, weight)           # (B, 2N, S) float32

    out = jax.lax.complex(y[:, :N, :], y[:, N:, :])     # single recombine pass
    return out.reshape(B, N, H, W)                      # already NCHW


# ---------------------------------------------------------------------------
if __name__ == "__main__":
    def run_case(input_size, B, H, W, tol):
        weight = make_fft_linear_weight(input_size)     # (2N, 2N) float32
        key = jax.random.PRNGKey(0)
        kr, ki = jax.random.split(key)
        xr = jax.random.normal(kr, (B, input_size, H, W), dtype=jnp.float32)
        xi = jax.random.normal(ki, (B, input_size, H, W), dtype=jnp.float32)
        complex_adc = jax.lax.complex(xr, xi)            # complex64 NCHW

        out = jax.block_until_ready(
            jax.jit(first_fft_linear_forward)(complex_adc, weight))

        # Pure-JAX f32 reference mirroring the PyTorch module's exact path.
        x_flat = jnp.transpose(complex_adc, (0, 2, 3, 1)).reshape(-1, input_size)
        comb = jnp.concatenate([jnp.real(x_flat), jnp.imag(x_flat)], axis=-1)
        y_flat = comb @ weight.T
        ref = jax.lax.complex(y_flat[:, :input_size], y_flat[:, input_size:])
        ref = jnp.transpose(ref.reshape(B, H, W, input_size), (0, 3, 1, 2))

        assert out.shape == complex_adc.shape and out.dtype == jnp.complex64
        rel = jnp.sqrt(jnp.sum(jnp.abs(out - ref) ** 2)) / \
              jnp.sqrt(jnp.sum(jnp.abs(ref) ** 2))
        assert float(rel) < tol, f"relative error too large: {float(rel)}"

    # Main case: lane-aligned spatial size (S = 256).
    run_case(input_size=64, B=2, H=16, W=16, tol=1e-2)
    # Non-128-multiple spatial size exercises the zero-pad / slice-back path
    # (S = 100 -> padded to 128): lane-dense stores, no masked vst.msk.
    run_case(input_size=32, B=2, H=10, W=10, tol=1e-2)

    print("KERNEL_OK")
</pallas_src>

<mosaic_0001>
module attributes {stable_mosaic.version = 11 : i64} {
  func.func @_fft_linear_kernel(%arg0: i32, %arg1: i32, %arg2: memref<128x128xf32, #tpu.memory_space<vmem>>, %arg3: memref<1x128x256xbf16, #tpu.memory_space<vmem>>, %arg4: memref<1x128x256xf32, #tpu.memory_space<vmem>>) attributes {dimension_semantics = [#tpu.dimension_semantics<parallel>, #tpu.dimension_semantics<parallel>], iteration_bounds = array<i64: 2, 1>, scalar_prefetch = 0 : i64, scratch_operands = 0 : i64, tpu.core_type = #tpu.core_type<tc>, window_params = [{pipeline_mode = #tpu.pipeline_mode<synchronous>, transform_indices = @transform_0, window_bounds = array<i64: 128, 128>}, {transform_indices = @transform_1, window_bounds = array<i64: 1, 128, 256>}, {transform_indices = @transform_2, window_bounds = array<i64: 1, 128, 256>}]} {
    %c0 = arith.constant 0 : index
    %c0_0 = arith.constant 0 : index
    %0 = vector.load %arg2[%c0, %c0_0] : memref<128x128xf32, #tpu.memory_space<vmem>>, vector<128x128xf32>
    %c0_1 = arith.constant 0 : index
    %c0_2 = arith.constant 0 : index
    %c0_3 = arith.constant 0 : index
    %1 = vector.load %arg3[%c0_1, %c0_2, %c0_3] : memref<1x128x256xbf16, #tpu.memory_space<vmem>>, vector<1x128x256xbf16>
    %2 = vector.shape_cast %1 : vector<1x128x256xbf16> to vector<128x256xbf16>
    %3 = arith.extf %2 : vector<128x256xbf16> to vector<128x256xf32>
    %cst = arith.constant dense<0.000000e+00> : vector<128x256xf32>
    %4 = tpu.matmul %0, %3, %cst {dimension_numbers = #tpu.dot_dimension_numbers<[1], [0], [0], [1], [0, 0, 1, 1], [], []>} : vector<128x128xf32>, vector<128x256xf32>, vector<128x256xf32> -> vector<128x256xf32>
    %c0_4 = arith.constant 0 : index
    %c0_5 = arith.constant 0 : index
    %c0_6 = arith.constant 0 : index
    %5 = vector.load %arg4[%c0_4, %c0_5, %c0_6] : memref<1x128x256xf32, #tpu.memory_space<vmem>>, vector<1x128x256xf32>
    %6 = vector.shape_cast %5 : vector<1x128x256xf32> to vector<128x256xf32>
    %7 = vector.shape_cast %4 : vector<128x256xf32> to vector<1x128x256xf32>
    tpu.vector_store %arg4[%c0_4, %c0_5, %c0_6], %7 {strides = array<i32>} : memref<1x128x256xf32, #tpu.memory_space<vmem>>, vector<1x128x256xf32>,
    return
  }
  func.func @transform_0(%arg0: i32, %arg1: i32) -> (i32, i32) {
    %c0_i32 = arith.constant 0 : i32
    %c0_i32_0 = arith.constant 0 : i32
    %c0_i32_1 = arith.constant 0 : i32
    return %c0_i32, %c0_i32_0 : i32, i32
  }
  func.func @transform_1(%arg0: i32, %arg1: i32) -> (i32, i32, i32) {
    %c0_i32 = arith.constant 0 : i32
    %c0_i32_0 = arith.constant 0 : i32
    return %arg0, %c0_i32, %arg1 : i32, i32, i32
  }
  func.func @transform_2(%arg0: i32, %arg1: i32) -> (i32, i32, i32) {
    %c0_i32 = arith.constant 0 : i32
    %c0_i32_0 = arith.constant 0 : i32
    return %arg0, %c0_i32, %arg1 : i32, i32, i32
  }
}

</mosaic_0001>

<bundles_post_ra>
// kernel: custom-call
= control target key start
LH: loop header
LB: loop body
LE: loop exit
PB: predicated region body
PF: predicated region fallthrough
CT: control target
= control target key end

     0   :  { %2 = vsyncpa [#allocation0], 0  ;;  %s61_s0 = inlined_call_operand.hbm [shape: c64[2,64,16,16], index: 0, kind: input, shape index: {}]   ;;  %s62_s1 = inlined_call_operand.vmem [shape: f32[2,64,16,16], index: 1, kind: output, shape index: {}]  }
   0x1   :  { %s3_s8 = sshll.u32 %s62_s1, 4  ;;  %s9_s11 = scalar_lea.hbm %s61_s0, 8192  ;;  %s4_s8 = int_to_ptr.vmem [resolvable:$true] %s3_s8 }
   0x2   :  { %p10_p0 = scmp.ne.s32.totalorder %s61_s0, %s9_s11  ;;  %s11_s16 = scalar_lea.hbm %s61_s0, 16384 }
   0x3   :  { %p12_p1 = scmp.lt.u32.totalorder %s11_s16, %s9_s11  ;;  %p13_p2 = scmp.lt.u32.totalorder %s9_s11, %s61_s0 }
   0x5   :  { %p14_p3 = por %p13_p2, %p12_p1 }
   0x7   :  { %p15_p4 = pnand %p14_p3, %p10_p0 }
   0x9   :  { %18 = shalt.err (!%p15_p4)  }
   0xa   :  { %s19_s1 = scalar_lea.vmem %s4_s8, 8192  ;;  %p24_p6 = scmp.lt.s32.totalorder %s4_s8, %s4_s8 }
   0xb   :  { %p20_p5 = scmp.ne.s32.totalorder %s4_s8, %s19_s1  ;;  %p25_p7 = scmp.lt.s32.totalorder %s19_s1, %s19_s1 }
   0xd   :  { %p26_p8 = por %p25_p7, %p24_p6 }
   0xf   :  { %p27_p9 = pnand %p26_p8, %p20_p5 }
  0x11   :  { %30 = shalt.err (!%p27_p9)  }
  0x12   :  { %6 = dma.hbm_to_vmem [thread:$0]  %s61_s0, 8192, %s4_s8, [#allocation0] }
  0x13   :  { %31 = dma.done.wait [#allocation0], 8192  }
  0x14   :  { %32 = vsyncadd [#allocation0], 4294959104 }
  0x15   :  { %8 = vsyncpa [#allocation0], 1 }

// kernel: custom-call.1
= control target key start
LH: loop header
LB: loop body
LE: loop exit
PB: predicated region body
PF: predicated region fallthrough
CT: control target
= control target key end

     0   :  { %s59_s0 = inlined_call_operand.hbm [shape: c64[2,64,16,16], index: 0, kind: input, shape index: {}]   ;;  %s60_s1 = inlined_call_operand.vmem [shape: f32[2,64,16,16], index: 1, kind: output, shape index: {}]  }
   0x1   :  { %s2_s8 = scalar_lea.hbm %s59_s0, 8192 }
   0x2   :  { %3 = vsyncpa [#allocation0], 0  ;;  %s4_s11 = sshll.u32 %s60_s1, 4  ;;  %s34_s14 = scalar_lea.hbm %s59_s0, 16384  ;;  %s5_s11 = int_to_ptr.vmem [resolvable:$true] %s4_s11 }
   0x3   :  { %p11_p0 = scmp.ne.s32.totalorder %s2_s8, %s34_s14  ;;  %p13_p1 = scmp.lt.u32.totalorder %s2_s8, %s59_s0 }
   0x4   :  { %p14_p2 = scmp.lt.u32.totalorder %s34_s14, %s34_s14  ;;  %p16_p4 = scmp.lt.u32.totalorder %s34_s14, %s2_s8 }
   0x6   :  { %p15_p3 = por %p14_p2, %p13_p1 }
   0x8   :  { %p17_p5 = por %p16_p4, %p15_p3 }
   0xa   :  { %p18_p6 = pnand %p17_p5, %p11_p0 }
   0xc   :  { %21 = shalt.err (!%p18_p6)  }
   0xd   :  { %s22_s17 = scalar_lea.vmem %s5_s11, 8192  ;;  %p27_p8 = scmp.lt.s32.totalorder %s5_s11, %s5_s11 }
   0xe   :  { %p23_p7 = scmp.ne.s32.totalorder %s5_s11, %s22_s17  ;;  %p28_p9 = scmp.lt.s32.totalorder %s22_s17, %s22_s17 }
  0x10   :  { %p29_p10 = por %p28_p9, %p27_p8 }
  0x12   :  { %p30_p11 = pnand %p29_p10, %p23_p7 }
  0x14   :  { %33 = shalt.err (!%p30_p11)  }
  0x15   :  { %7 = dma.hbm_to_vmem [thread:$0]  %s2_s8, 8192, %s5_s11, [#allocation0] }
  0x16   :  { %35 = dma.done.wait [#allocation0], 8192  }
  0x17   :  { %36 = vsyncadd [#allocation0], 4294959104 }
  0x18   :  { %9 = vsyncpa [#allocation0], 1 }

// kernel: custom-call.2
= control target key start
LH: loop header
LB: loop body
LE: loop exit
PB: predicated region body
PF: predicated region fallthrough
CT: control target
= control target key end

     0   :  { %s126_s0 = inlined_call_operand.vmem [shape: f32[2,64,16,16], index: 0, kind: input, shape index: {}]   ;;  %s127_s1 = inlined_call_operand.vmem [shape: f32[2,64,16,16], index: 1, kind: input, shape index: {}]   ;;  %s128_s2 = inlined_call_operand.hbm [shape: c64[2,64,16,16], index: 2, kind: output, shape index: {}]  }
   0x1   :  { %s87_s11 = scalar_lea.hbm %s128_s2, 8192 }
   0x2   :  { %4 = vsyncpa [#allocation0], 0  ;;  %s5_s14 = sshll.u32 %s126_s0, 4  ;;  %s6_s14 = int_to_ptr.vmem [resolvable:$true] %s5_s14 }
   0x3   :  { %s18_s15 = scalar_lea.vmem %s6_s14, 8192  ;;  %p23_p1 = scmp.lt.s32.totalorder %s6_s14, %s6_s14 }
   0x4   :  { %p19_p0 = scmp.ne.s32.totalorder %s6_s14, %s18_s15  ;;  %p24_p2 = scmp.lt.s32.totalorder %s18_s15, %s18_s15 }
   0x6   :  { %p25_p3 = por %p24_p2, %p23_p1 }
   0x8   :  { %p26_p4 = pnand %p25_p3, %p19_p0 }
   0xa   :  { %29 = shalt.err (!%p26_p4)  }
   0xb   :  { %p31_p5 = scmp.ne.s32.totalorder %s128_s2, %s87_s11  ;;  %s32_s0 = scalar_lea.hbm %s128_s2, 16384 }
   0xc   :  { %p33_p6 = scmp.lt.u32.totalorder %s32_s0, %s87_s11  ;;  %p34_p7 = scmp.lt.u32.totalorder %s87_s11, %s128_s2 }
   0xe   :  { %p35_p8 = por %p34_p7, %p33_p6 }
  0x10   :  { %p36_p9 = pnand %p35_p8, %p31_p5 }
  0x12   :  { %39 = shalt.err (!%p36_p9)  }
  0x13   :  { %8 = dma.vmem_to_hbm [thread:$0]  %s6_s14, 8192, %s128_s2, [#allocation0] }
  0x14   :  { %65 = dma.done.wait [#allocation0], 8192  }
  0x15   :  { %66 = vsyncadd [#allocation0], 4294959104 }
  0x16   :  { %10 = vsyncpa [#allocation0], 1 }
  0x17   :  { %11 = vsyncpa [#allocation1], 0  ;;  %s12_s28 = sshll.u32 %s127_s1, 4  ;;  %s13_s28 = int_to_ptr.vmem [resolvable:$true] %s12_s28 }
  0x18   :  { %s40_s29 = scalar_lea.vmem %s13_s28, 8192  ;;  %p45_p11 = scmp.lt.s32.totalorder %s13_s28, %s13_s28 }
  0x19   :  { %p41_p10 = scmp.ne.s32.totalorder %s13_s28, %s40_s29  ;;  %p46_p12 = scmp.lt.s32.totalorder %s40_s29, %s40_s29 }
  0x1b   :  { %p47_p13 = por %p46_p12, %p45_p11 }
  0x1d   :  { %p48_p0 = pnand %p47_p13, %p41_p10 }
  0x1f   :  { %51 = shalt.err (!%p48_p0)  }
  0x20   :  { %p53_p1 = scmp.ne.s32.totalorder %s87_s11, %s32_s0  ;;  %p56_p2 = scmp.lt.u32.totalorder %s32_s0, %s32_s0 }
  0x22   :  { %p57_p3 = por %p56_p2, %p34_p7 }
  0x24   :  { %p59_p4 = por %p57_p3, %p33_p6 }
  0x26   :  { %p60_p5 = pnand %p59_p4, %p53_p1 }
  0x28   :  { %63 = shalt.err (!%p60_p5)  }
  0x29   :  { %15 = dma.vmem_to_hbm [thread:$0]  %s13_s28, 8192, %s87_s11, [#allocation1] }
  0x2a   :  { %67 = dma.done.wait [#allocation1], 8192  }
  0x2b   :  { %68 = vsyncadd [#allocation1], 4294959104 }
  0x2c   :  { %17 = vsyncpa [#allocation1], 1 }

// kernel: first_fft_linear_forward.1
= control target key start
LH: loop header
LB: loop body
LE: loop exit
PB: predicated region body
PF: predicated region fallthrough
CT: control target
= control target key end

     0   :  { %s693_s9 = smov 0   ;;  %s695_s10 = smov 0   ;;  %s846_s0 = inlined_call_operand.vmem [shape: f32[128,128], index: 0, kind: input, shape index: {}]   ;;  %s847_s1 = inlined_call_operand.vmem [shape: bf16[2,128,256], index: 1, kind: input, shape index: {}]   ;;  %s848_s2 = inlined_call_operand.vmem [shape: f32[2,128,256], index: 2, kind: output, shape index: {}]  }
   0x1   :  { %s697_s11 = smov 0  }
   0x2 LB: > { %s24_s12 = sadd.s32 1, %s671_s10  ;;  %p531_p0 = scmp.ge.s32.totalorder %s675_s11, 1  ;;  %s675_s11 = sphi %s697_s11, %s12_s11   ;;  %s671_s10 = sphi %s695_s10, %s850_s10   ;;  %s667_s9 = sphi %s693_s9, %s849_s9  }
   0x3   : > { %p26_p1 = scmp.ge.s32.totalorder %s24_s12, 2  ;;  %p133_p2 = scmp.lt.s32.totalorder %s675_s11, 3 }
   0x5   : > { %s852_s12 = smov (%p26_p1, %s24_s12), 0  ;;  %p134_p3 = pnand %p531_p0, %p133_p2 }
   0x6   : > { %p164_p4 = scmp.lt.s32.totalorder (!%p134_p3), %s667_s9, 1  ;;  %v677_v0 = vmov (!%p134_p3), 0.0   ;;  %v183_v17 = vld [vmem:[%s846_s0] sm:$0xff] (!%p134_p3)  ;;  %v184_v19 = vld [vmem:[%s846_s0 + $0x8] sm:$0xff] (!%p134_p3)  ;;  %v185_v21 = vld [vmem:[%s846_s0 + $0x10] sm:$0xff] (!%p134_p3) }
   0x7   : > { %137 = sbr.rel (%p134_p3) target bundleno = 292 (0x124), region = 28  ;;  %311 = vmatprep.mubr.f32.mxu0 (!%p134_p3), %v677_v0  ;;  %359 = vmatprep.mubr.f32.mxu1 (!%p134_p3), %v677_v0  ;;  %v191_v18 = vld [vmem:[%s846_s0 + $0x40] sm:$0xff] (!%p134_p3)  ;;  %v192_v20 = vld [vmem:[%s846_s0 + $0x48] sm:$0xff] (!%p134_p3)  ;;  %v193_v22 = vld [vmem:[%s846_s0 + $0x50] sm:$0xff] (!%p134_p3) }
   0x8   : > { %v186_v23 = vld [vmem:[%s846_s0 + $0x18] sm:$0xff] (!%p134_p3)  ;;  %v187_v25 = vld [vmem:[%s846_s0 + $0x20] sm:$0xff] (!%p134_p3)  ;;  %v188_v27 = vld [vmem:[%s846_s0 + $0x28] sm:$0xff] (!%p134_p3) }
   0x9   : > { %v194_v24 = vld [vmem:[%s846_s0 + $0x58] sm:$0xff] (!%p134_p3)  ;;  %v195_v26 = vld [vmem:[%s846_s0 + $0x60] sm:$0xff] (!%p134_p3)  ;;  %v196_v28 = vld [vmem:[%s846_s0 + $0x68] sm:$0xff] (!%p134_p3) }
   0xa   : > { %v189_v29 = vld [vmem:[%s846_s0 + $0x30] sm:$0xff] (!%p134_p3)  ;;  %v190_v31 = vld [vmem:[%s846_s0 + $0x38] sm:$0xff] (!%p134_p3) }
   0xb   : > { %v197_v30 = vld [vmem:[%s846_s0 + $0x70] sm:$0xff] (!%p134_p3)  ;;  %v198_v32 = vld [vmem:[%s846_s0 + $0x78] sm:$0xff] (!%p134_p3) }
   0xe   : > { %s854_s9 = smov (!%p164_p4, %s667_s9), 1 }
   0xf   : > { %s538_s13 = sshll.u32 %s854_s9, 7  ;;  %s539_s25 = sshll.u32 %s854_s9, 8 }
  0x10   : > { %s719_s16 = scalar_lea.vmem %s847_s1, %s538_s13  ;;  %s803_s28 = scalar_lea.vmem %s848_s2, %s539_s25 }
  0x11   : > { %v629_v1 = vld [vmem:[%s719_s16 + $0x4] ss:$8 sps:$4 sm:$0xff]   ;;  %v631_v2 = vld [vmem:[%s719_s16] ss:$8 sps:$4 sm:$0xff]   ;;  %v632_v3 = vld [vmem:[%s719_s16 + $0x14] ss:$8 sps:$4 sm:$0xff]  }
  0x12   : > { %541 = vmatprep.subr.bf16.mxu0 %v629_v1  ;;  %572 = vmatprep.subr.bf16.mxu1 %v629_v1  ;;  %v634_v4 = vld [vmem:[%s719_s16 + $0x10] ss:$8 sps:$4 sm:$0xff]   ;;  %v635_v5 = vld [vmem:[%s719_s16 + $0x24] ss:$8 sps:$4 sm:$0xff]   ;;  %v637_v6 = vld [vmem:[%s719_s16 + $0x20] ss:$8 sps:$4 sm:$0xff]  }
  0x13   : > { %543 = vmatpush1.bf16.msra.mxu0 %v631_v2  ;;  %580 = vmatpush1.bf16.msra.mxu1 %v631_v2  ;;  %v638_v7 = vld [vmem:[%s719_s16 + $0x34] ss:$8 sps:$4 sm:$0xff]   ;;  %v640_v8 = vld [vmem:[%s719_s16 + $0x30] ss:$8 sps:$4 sm:$0xff]   ;;  %v641_v9 = vld [vmem:[%s719_s16 + $0x44] ss:$8 sps:$4 sm:$0xff]  }
  0x14   : > { %545 = vmatprep.subr.bf16.mxu0 %v632_v3  ;;  %573 = vmatprep.subr.bf16.mxu1 %v632_v3  ;;  %v643_v10 = vld [vmem:[%s719_s16 + $0x40] ss:$8 sps:$4 sm:$0xff]   ;;  %v644_v11 = vld [vmem:[%s719_s16 + $0x54] ss:$8 sps:$4 sm:$0xff]   ;;  %v646_v12 = vld [vmem:[%s719_s16 + $0x50] ss:$8 sps:$4 sm:$0xff]  }
  0x15   : > { %v647_v13 = vld [vmem:[%s719_s16 + $0x64] ss:$8 sps:$4 sm:$0xff]   ;;  %v649_v14 = vld [vmem:[%s719_s16 + $0x60] ss:$8 sps:$4 sm:$0xff]   ;;  %v650_v15 = vld [vmem:[%s719_s16 + $0x74] ss:$8 sps:$4 sm:$0xff]  }
  0x16   : > { %v652_v16 = vld [vmem:[%s719_s16 + $0x70] ss:$8 sps:$4 sm:$0xff]  }
  0x17   : > { %547 = vmatpush1.bf16.msra.mxu0 %v634_v4  ;;  %581 = vmatpush1.bf16.msra.mxu1 %v634_v4 }
  0x18   : > { %549 = vmatprep.subr.bf16.mxu0 %v635_v5  ;;  %574 = vmatprep.subr.bf16.mxu1 %v635_v5 }
  0x1b   : > { %551 = vmatpush1.bf16.msra.mxu0 %v637_v6  ;;  %582 = vmatpush1.bf16.msra.mxu1 %v637_v6 }
  0x1c   : > { %553 = vmatprep.subr.bf16.mxu0 %v638_v7  ;;  %575 = vmatprep.subr.bf16.mxu1 %v638_v7 }
  0x1f   : > { %555 = vmatpush1.bf16.msra.mxu0 %v640_v8  ;;  %583 = vmatpush1.bf16.msra.mxu1 %v640_v8 }
  0x20   : > { %557 = vmatprep.subr.bf16.mxu0 %v641_v9  ;;  %576 = vmatprep.subr.bf16.mxu1 %v641_v9 }
  0x23   : > { %559 = vmatpush1.bf16.msra.mxu0 %v643_v10  ;;  %584 = vmatpush1.bf16.msra.mxu1 %v643_v10 }
  0x24   : > { %561 = vmatprep.subr.bf16.mxu0 %v644_v11  ;;  %577 = vmatprep.subr.bf16.mxu1 %v644_v11 }
  0x27   : > { %563 = vmatpush1.bf16.msra.mxu0 %v646_v12  ;;  %585 = vmatpush1.bf16.msra.mxu1 %v646_v12 }
  0x28   : > { %565 = vmatprep.subr.bf16.mxu0 %v647_v13  ;;  %578 = vmatprep.subr.bf16.mxu1 %v647_v13 }
  0x2b   : > { %567 = vmatpush1.bf16.msra.mxu0 %v649_v14  ;;  %586 = vmatpush1.bf16.msra.mxu1 %v649_v14 }
  0x2c   : > { %569 = vmatprep.subr.bf16.mxu0 %v650_v15  ;;  %579 = vmatprep.subr.bf16.mxu1 %v650_v15 }
  0x2f   : > { %571 = vmatpush1.bf16.msra.mxu0 %v652_v16  ;;  %587 = vmatpush1.bf16.msra.mxu1 %v652_v16 }
  0x32   : > { %312 = vmatmul.mubr.f32.vlgmr.msra.gmra.mrb[0].mxu0 %v183_v17  ;;  %360 = vmatmul.mubr.f32.vlgmr.msra.gmra.mrb[0].mxu1 %v191_v18 }
  0x33   : > { %317 = vmatprep.mubr.f32.mxu0 %v677_v0  ;;  %365 = vmatprep.mubr.f32.mxu1 %v677_v0 }
  0x36   : > { %318 = vmatmul.mubr.f32.gmra.mrb[2].mxu0 %v184_v19  ;;  %366 = vmatmul.mubr.f32.gmra.mrb[2].mxu1 %v192_v20 }
  0x37   : > { %323 = vmatprep.mubr.f32.mxu0 %v677_v0  ;;  %371 = vmatprep.mubr.f32.mxu1 %v677_v0 }
  0x3a   : > { %324 = vmatmul.mubr.f32.gmra.mrb[4].mxu0 %v185_v21  ;;  %372 = vmatmul.mubr.f32.gmra.mrb[4].mxu1 %v193_v22 }
  0x3b   : > { %329 = vmatprep.mubr.f32.mxu0 %v677_v0  ;;  %377 = vmatprep.mubr.f32.mxu1 %v677_v0 }
  0x3e   : > { %330 = vmatmul.mubr.f32.gmra.mrb[6].mxu0 %v186_v23  ;;  %378 = vmatmul.mubr.f32.gmra.mrb[6].mxu1 %v194_v24 }
  0x3f   : > { %335 = vmatprep.mubr.f32.mxu0 %v677_v0  ;;  %383 = vmatprep.mubr.f32.mxu1 %v677_v0 }
  0x42   : > { %336 = vmatmul.mubr.f32.gmra.mrb[8].mxu0 %v187_v25  ;;  %384 = vmatmul.mubr.f32.gmra.mrb[8].mxu1 %v195_v26 }
  0x43   : > { %341 = vmatprep.mubr.f32.mxu0 %v677_v0  ;;  %389 = vmatprep.mubr.f32.mxu1 %v677_v0 }
  0x46   : > { %342 = vmatmul.mubr.f32.gmra.mrb[10].mxu0 %v188_v27  ;;  %390 = vmatmul.mubr.f32.gmra.mrb[10].mxu1 %v196_v28 }
  0x47   : > { %347 = vmatprep.mubr.f32.mxu0 %v677_v0  ;;  %395 = vmatprep.mubr.f32.mxu1 %v677_v0 }
  0x4a   : > { %348 = vmatmul.mubr.f32.gmra.mrb[12].mxu0 %v189_v29  ;;  %396 = vmatmul.mubr.f32.gmra.mrb[12].mxu1 %v197_v30 }
  0x4b   : > { %353 = vmatprep.mubr.f32.mxu0 %v677_v0  ;;  %401 = vmatprep.mubr.f32.mxu1 %v677_v0 }
  0x4e   : > { %354 = vmatmul.mubr.f32.gmra.mrb[14].mxu0 %v190_v31  ;;  %402 = vmatmul.mubr.f32.gmra.mrb[14].mxu1 %v198_v32 }
 0x105   : > { %v313_v33 = vpop.f32.mrb[0].mxu0  ;;  %v361_v34 = vpop.f32.mrb[0].mxu1 }
 0x106   : > { %408 = vst [vmem:[%s803_s28] sm:$0xff] %v313_v33  ;;  %424 = vst [vmem:[%s803_s28 + $0x80] sm:$0xff] %v361_v34  ;;  %v315_v35 = vpop.f32.mrb[1].mxu0  ;;  %v363_v36 = vpop.f32.mrb[1].mxu1 }
 0x107   : > { %409 = vst [vmem:[%s803_s28 + $0x8] sm:$0xff] %v315_v35  ;;  %425 = vst [vmem:[%s803_s28 + $0x88] sm:$0xff] %v363_v36 }
 0x109   : > { %v319_v37 = vpop.f32.mrb[2].mxu0  ;;  %v367_v38 = vpop.f32.mrb[2].mxu1 }
 0x10a   : > { %410 = vst [vmem:[%s803_s28 + $0x10] sm:$0xff] %v319_v37  ;;  %426 = vst [vmem:[%s803_s28 + $0x90] sm:$0xff] %v367_v38  ;;  %v321_v39 = vpop.f32.mrb[3].mxu0  ;;  %v369_v40 = vpop.f32.mrb[3].mxu1 }
 0x10b   : > { %411 = vst [vmem:[%s803_s28 + $0x18] sm:$0xff] %v321_v39  ;;  %427 = vst [vmem:[%s803_s28 + $0x98] sm:$0xff] %v369_v40 }
 0x10d   : > { %v325_v41 = vpop.f32.mrb[4].mxu0  ;;  %v373_v42 = vpop.f32.mrb[4].mxu1 }
 0x10e   : > { %412 = vst [vmem:[%s803_s28 + $0x20] sm:$0xff] %v325_v41  ;;  %428 = vst [vmem:[%s803_s28 + $0xa0] sm:$0xff] %v373_v42  ;;  %v327_v43 = vpop.f32.mrb[5].mxu0  ;;  %v375_v44 = vpop.f32.mrb[5].mxu1 }
 0x10f   : > { %413 = vst [vmem:[%s803_s28 + $0x28] sm:$0xff] %v327_v43  ;;  %429 = vst [vmem:[%s803_s28 + $0xa8] sm:$0xff] %v375_v44 }
 0x111   : > { %v331_v45 = vpop.f32.mrb[6].mxu0  ;;  %v379_v46 = vpop.f32.mrb[6].mxu1 }
 0x112   : > { %414 = vst [vmem:[%s803_s28 + $0x30] sm:$0xff] %v331_v45  ;;  %430 = vst [vmem:[%s803_s28 + $0xb0] sm:$0xff] %v379_v46  ;;  %v333_v47 = vpop.f32.mrb[7].mxu0  ;;  %v381_v48 = vpop.f32.mrb[7].mxu1 }
 0x113   : > { %415 = vst [vmem:[%s803_s28 + $0x38] sm:$0xff] %v333_v47  ;;  %431 = vst [vmem:[%s803_s28 + $0xb8] sm:$0xff] %v381_v48 }
 0x115   : > { %v337_v49 = vpop.f32.mrb[8].mxu0  ;;  %v385_v50 = vpop.f32.mrb[8].mxu1 }
 0x116   : > { %416 = vst [vmem:[%s803_s28 + $0x40] sm:$0xff] %v337_v49  ;;  %432 = vst [vmem:[%s803_s28 + $0xc0] sm:$0xff] %v385_v50  ;;  %v339_v51 = vpop.f32.mrb[9].mxu0  ;;  %v387_v52 = vpop.f32.mrb[9].mxu1 }
 0x117   : > { %417 = vst [vmem:[%s803_s28 + $0x48] sm:$0xff] %v339_v51  ;;  %433 = vst [vmem:[%s803_s28 + $0xc8] sm:$0xff] %v387_v52 }
 0x119   : > { %v343_v53 = vpop.f32.mrb[10].mxu0  ;;  %v391_v54 = vpop.f32.mrb[10].mxu1 }
 0x11a   : > { %418 = vst [vmem:[%s803_s28 + $0x50] sm:$0xff] %v343_v53  ;;  %434 = vst [vmem:[%s803_s28 + $0xd0] sm:$0xff] %v391_v54  ;;  %v345_v55 = vpop.f32.mrb[11].mxu0  ;;  %v393_v56 = vpop.f32.mrb[11].mxu1 }
 0x11b   : > { %419 = vst [vmem:[%s803_s28 + $0x58] sm:$0xff] %v345_v55  ;;  %435 = vst [vmem:[%s803_s28 + $0xd8] sm:$0xff] %v393_v56 }
 0x11d   : > { %v349_v57 = vpop.f32.mrb[12].mxu0  ;;  %v397_v58 = vpop.f32.mrb[12].mxu1 }
 0x11e   : > { %420 = vst [vmem:[%s803_s28 + $0x60] sm:$0xff] %v349_v57  ;;  %436 = vst [vmem:[%s803_s28 + $0xe0] sm:$0xff] %v397_v58  ;;  %v351_v59 = vpop.f32.mrb[13].mxu0  ;;  %v399_v60 = vpop.f32.mrb[13].mxu1 }
 0x11f   : > { %421 = vst [vmem:[%s803_s28 + $0x68] sm:$0xff] %v351_v59  ;;  %437 = vst [vmem:[%s803_s28 + $0xe8] sm:$0xff] %v399_v60 }
 0x121   : > { %v355_v61 = vpop.f32.mrb[14].mxu0  ;;  %v403_v62 = vpop.f32.mrb[14].mxu1 }
 0x122   : > { %422 = vst [vmem:[%s803_s28 + $0x70] sm:$0xff] %v355_v61  ;;  %438 = vst [vmem:[%s803_s28 + $0xf0] sm:$0xff] %v403_v62  ;;  %v357_v63 = vpop.f32.mrb[15].mxu0  ;;  %v405_v0 = vpop.f32.mrb[15].mxu1 }
 0x123   : > { %423 = vst [vmem:[%s803_s28 + $0x78] sm:$0xff] %v357_v63  ;;  %439 = vst [vmem:[%s803_s28 + $0xf8] sm:$0xff] %v405_v0 }
 0x124 PF: > { %s12_s11 = sadd.s32 1, %s675_s11   ;;  %s849_s9 = smov %s671_s10 }
 0x125   : > { %p9_p5 = scmp.ge.s32.totalorder %s12_s11, 4   ;;  %s850_s10 = smov %s852_s12 }
 0x127   :  { %11 = sbr.rel (!%p9_p5) target bundleno = 2 (0x2), region = 58 }

</bundles_post_ra>
